<compile_context>
chip_gen: v5e
topology: v5e:2x2
jax: 0.10.0
libtpu: 0.0.40
codegen_flags: <defaults>
</compile_context>

<pallas_src>
import functools

import jax
import jax.numpy as jnp
from jax.experimental import pallas as pl
from jax.experimental.pallas import tpu as pltpu


def _depthwise_flat(xb, w9, W):
    """3x3 depthwise conv, stride=1, zero-pad=1, on a (rows, H*W) layout.

    Each tap (dy, dx) reads src[p + dy*W + dx]; the shift is a pltpu.roll
    (XLU).  Column padding comes from two pre-masked copies of the input
    (col W-1 zeroed for dx=-1 taps, col 0 zeroed for dx=+1 taps); row padding
    (top/bottom halo + roll wrap-around) is one mask per dy != 0 tap group.
    """
    rows, HW = xb.shape
    lane = jax.lax.broadcasted_iota(jnp.int32, (rows, HW), 1)
    col = lane % W

    x_mid = xb
    x_dxm = jnp.where(col != W - 1, xb, 0.0)     # feeds dx = -1 taps
    x_dxp = jnp.where(col != 0, xb, 0.0)         # feeds dx = +1 taps
    not_first_row = lane >= W                    # gate for the dy = -1 group
    not_last_row = lane < HW - W                 # gate for the dy = +1 group

    def tap(src, dy, dx):
        k = (dy + 1) * 3 + (dx + 1)
        s = dy * W + dx                          # out[p] = src[p + s]
        if s != 0:
            src = pltpu.roll(src, (-s) % HW, axis=1)   # XLU lane rotate
        return src * w9[:, k:k + 1]

    def tap_row(dy):
        return tap(x_dxm, dy, -1) + tap(x_mid, dy, 0) + tap(x_dxp, dy, 1)

    acc = tap_row(0)
    acc = acc + jnp.where(not_first_row, tap_row(-1), 0.0)
    acc = acc + jnp.where(not_last_row, tap_row(1), 0.0)
    return acc


def _bn1_stats_kernel(x_ref, wdw_ref, stats_ref, *, W):
    """Pass 1: depthwise conv of one (Nb*Cin, HW) tile; accumulate sum/sum-sq."""
    dw = _depthwise_flat(x_ref[...].astype(jnp.float32), wdw_ref[...], W)
    tile = jnp.concatenate(
        [jnp.sum(dw, axis=1, keepdims=True),
         jnp.sum(dw * dw, axis=1, keepdims=True)], axis=1)       # (rows, 2)

    @pl.when(pl.program_id(1) == 0)
    def _init():
        stats_ref[...] = jnp.zeros_like(stats_ref)

    stats_ref[...] += tile[None]


def _pointwise_kernel(x_ref, wdw_ref, p1_ref, wpw_ref, pw_ref, stats_ref,
                      h_ref, *, W, nb):
    """Pass 2: depthwise -> BN1 -> ReLU -> one wide 1x1 MXU matmul; BN2 stats."""
    HW = x_ref.shape[1]
    cin = x_ref.shape[0] // nb
    cout = pw_ref.shape[0] // nb

    dw = _depthwise_flat(x_ref[...].astype(jnp.float32), wdw_ref[...], W)
    p1 = p1_ref[...]                                             # (nb*cin, 2)
    h = jnp.maximum(dw * p1[:, 0:1] + p1[:, 1:2], 0.0)           # BN1 + ReLU

    # Stage each sample at lane offset i*HW -> one (Cout,Cin)x(Cin,Nb*HW)
    # matmul (amortizes MXU weight pushes / drains), bf16 operands, f32 acc.
    for i in range(nb):
        h_ref[:, i * HW:(i + 1) * HW] = (
            h[i * cin:(i + 1) * cin, :].astype(h_ref.dtype))
    pw = jnp.dot(wpw_ref[...], h_ref[...],
                 preferred_element_type=jnp.float32)             # (cout, nb*HW)

    for i in range(nb):
        pw_ref[i * cout:(i + 1) * cout, :] = (
            pw[:, i * HW:(i + 1) * HW].astype(pw_ref.dtype))

    tile = jnp.concatenate(
        [jnp.sum(pw, axis=1, keepdims=True),
         jnp.sum(pw * pw, axis=1, keepdims=True)], axis=1)       # (cout, 2)

    @pl.when(pl.program_id(1) == 0)
    def _init():
        stats_ref[...] = jnp.zeros_like(stats_ref)

    stats_ref[...] += tile[None]


def _bn2_kernel(pw_ref, p2_ref, out_ref):
    """Pass 3: BN2 + ReLU, elementwise on a (Nb*Cout, HW) tile (bf16 -> f32)."""
    pw = pw_ref[...].astype(jnp.float32)
    p2 = p2_ref[...]                                             # (rows, 2)
    out_ref[...] = jnp.maximum(pw * p2[:, 0:1] + p2[:, 1:2],
                               0.0).astype(out_ref.dtype)


def _scale_offset(stats, gamma, beta, count, eps):
    """Fold batch stats + affine params into per-channel (scale, offset)."""
    mean = stats[:, 0] / count
    var = stats[:, 1] / count - mean * mean    # biased (training-mode) var
    # TODO(synk): shifted / two-pass variance for large-mean production nets.
    scale = gamma * jax.lax.rsqrt(var + eps)
    offset = beta - mean * scale
    return jnp.stack([scale, offset], axis=1)  # (C, 2)


def _vmem_limit_bytes():
    """~3/4 of physical VMEM: 96 MiB on v5e/v6e (128), 48 MiB on v7x (64)."""
    cap = 64 * 1024 * 1024                     # conservative fallback
    try:
        cap = int(getattr(pltpu.get_tpu_info(), "vmem_capacity_bytes", cap))
    except Exception:
        pass
    return min(cap * 3 // 4, 100 * 1024 * 1024)


def _pick_nb(N, Cin, Cout, HW, itemsize=4, target_bytes=2 << 20):
    """Samples per grid step: keep Nb*C sublane-aligned and the tile <= ~2 MiB."""
    best = None
    for cand in range(1, N + 1):
        if N % cand:
            continue
        layout_ok = (cand == N or
                     ((cand * Cin) % 8 == 0 and (cand * Cout) % 8 == 0))
        if not layout_ok:
            continue
        if best is None or cand * Cin * HW * itemsize <= target_bytes:
            best = cand
    return best if best is not None else N


def block_forward(x_nchw, params, *, stride=1, eps=1e-5,
                  matmul_dtype=jnp.bfloat16, pw_dtype=jnp.bfloat16):
    """Pallas implementation of Block.forward (training-mode BatchNorm)."""
    if stride != 1:
        # TODO(synk): stride=2 support (lane de-interleave of the tap sums).
        raise NotImplementedError("Pallas Block kernel implements stride=1.")
    wdw, gamma1, beta1, wpw, gamma2, beta2 = params
    N, Cin, H, W = x_nchw.shape
    Cout = wpw.shape[0]
    HW = H * W

    # Free HBM reshape: sublanes carry N*Cin rows, lanes carry H*W pixels.
    xf = x_nchw.reshape(N * Cin, HW)

    nb = _pick_nb(N, Cin, Cout, HW)
    steps = N // nb
    n_cores = 2 if (steps >= 2 and steps % 2 == 0) else 1   # v7x TC split
    steps_per_core = steps // n_cores
    rows_in = nb * Cin
    rows_out = nb * Cout

    wdw9 = jnp.tile(wdw.reshape(Cin, 9), (nb, 1))            # (rows_in, 9) f32
    wpw_mx = wpw.astype(matmul_dtype)                        # (Cout, Cin)

    vmem_limit = _vmem_limit_bytes()
    cp_reduce = pltpu.CompilerParams(
        dimension_semantics=("parallel", "arbitrary"),
        vmem_limit_bytes=vmem_limit)
    cp_parallel = pltpu.CompilerParams(
        dimension_semantics=("parallel",), vmem_limit_bytes=vmem_limit)

    batch_idx = lambda c, s: (c * steps_per_core + s, 0)
    x_spec = pl.BlockSpec((rows_in, HW), batch_idx)
    wdw_spec = pl.BlockSpec((rows_in, 9), lambda c, s: (0, 0))

    # ---- pass 1: BN1 batch statistics (per-core partial sum / sum-sq) ----
    stats1 = pl.pallas_call(
        functools.partial(_bn1_stats_kernel, W=W),
        out_shape=jax.ShapeDtypeStruct((n_cores, rows_in, 2), jnp.float32),
        grid=(n_cores, steps_per_core),
        in_specs=[x_spec, wdw_spec],
        out_specs=pl.BlockSpec((1, rows_in, 2), lambda c, s: (c, 0, 0)),
        compiler_params=cp_reduce,
    )(xf, wdw9)

    count = N * HW                       # stride=1 -> Ho*Wo == H*W
    stats1 = stats1.sum(axis=0).reshape(nb, Cin, 2).sum(axis=0)   # (Cin, 2)
    p1 = _scale_offset(stats1, gamma1, beta1, count, eps)
    p1_rep = jnp.tile(p1, (nb, 1))                                # (rows_in, 2)

    # ---- pass 2: depthwise + BN1 + ReLU + wide 1x1 matmul; BN2 stats ----
    pw, stats2 = pl.pallas_call(
        functools.partial(_pointwise_kernel, W=W, nb=nb),
        out_shape=(jax.ShapeDtypeStruct((N * Cout, HW), pw_dtype),
                   jax.ShapeDtypeStruct((n_cores, Cout, 2), jnp.float32)),
        grid=(n_cores, steps_per_core),
        in_specs=[x_spec, wdw_spec,
                  pl.BlockSpec((rows_in, 2), lambda c, s: (0, 0)),
                  pl.BlockSpec((Cout, Cin), lambda c, s: (0, 0))],
        out_specs=(pl.BlockSpec((rows_out, HW), batch_idx),
                   pl.BlockSpec((1, Cout, 2), lambda c, s: (c, 0, 0))),
        scratch_shapes=[pltpu.VMEM((Cin, nb * HW), matmul_dtype)],
        compiler_params=cp_reduce,
    )(xf, wdw9, p1_rep, wpw_mx)

    stats2 = stats2.sum(axis=0)                                   # (Cout, 2)
    p2 = _scale_offset(stats2, gamma2, beta2, count, eps)
    p2_rep = jnp.tile(p2, (nb, 1))                                # (rows_out, 2)

    # ---- pass 3: BN2 + ReLU (bf16 read, f32 write), batch-parallel ----
    out_flat = pl.pallas_call(
        _bn2_kernel,
        out_shape=jax.ShapeDtypeStruct((N * Cout, HW), jnp.float32),
        grid=(steps,),
        in_specs=[pl.BlockSpec((rows_out, HW), lambda s: (s, 0)),
                  pl.BlockSpec((rows_out, 2), lambda s: (0, 0))],
        out_specs=pl.BlockSpec((rows_out, HW), lambda s: (s, 0)),
        compiler_params=cp_parallel,
    )(pw, p2_rep)

    return out_flat.reshape(N, Cout, H, W)   # free reshape back to NCHW


def block_ref(x_nchw, params, *, stride=1, eps=1e-5):
    """Plain-JAX reference matching PyTorch Block.forward (training-mode BN)."""
    wdw, g1, b1, wpw, g2, b2 = params
    Cin = x_nchw.shape[1]

    def bn_relu(z, g, b):
        m = jnp.mean(z, axis=(0, 2, 3), keepdims=True)
        v = jnp.mean((z - m) ** 2, axis=(0, 2, 3), keepdims=True)
        zn = (z - m) / jnp.sqrt(v + eps)
        return jnp.maximum(zn * g.reshape(1, -1, 1, 1) + b.reshape(1, -1, 1, 1),
                           0.0)

    y = jax.lax.conv_general_dilated(
        x_nchw, wdw[:, None, :, :], (stride, stride), ((1, 1), (1, 1)),
        feature_group_count=Cin,
        dimension_numbers=("NCHW", "OIHW", "NCHW"))
    y = bn_relu(y, g1, b1)
    y = jax.lax.conv_general_dilated(
        y, wpw[:, :, None, None], (1, 1), ((0, 0), (0, 0)),
        dimension_numbers=("NCHW", "OIHW", "NCHW"))
    y = bn_relu(y, g2, b2)
    return y


def init_params(key, in_planes, out_planes):
    """Deterministic params mirroring the PyTorch module's weight shapes."""
    k1, k2 = jax.random.split(key)
    wdw = 0.1 * jax.random.normal(k1, (in_planes, 3, 3), jnp.float32)
    wpw = 0.1 * jax.random.normal(k2, (out_planes, in_planes), jnp.float32)
    g1 = jnp.ones((in_planes,), jnp.float32)
    b1 = jnp.zeros((in_planes,), jnp.float32)
    g2 = jnp.ones((out_planes,), jnp.float32)
    b2 = jnp.zeros((out_planes,), jnp.float32)
    return (wdw, g1, b1, wpw, g2, b2)


if __name__ == "__main__":
    key = jax.random.PRNGKey(0)
    kx, kp = jax.random.split(key)

    N, Cin, H, W = 2, 4, 16, 16
    Cout, stride = 8, 1

    x = jax.random.normal(kx, (N, Cin, H, W), jnp.float32)   # NCHW like PyTorch
    params = init_params(kp, Cin, Cout)

    ref = jax.block_until_ready(block_ref(x, params, stride=stride))

    # Exact path (f32 MXU operands + f32 intermediate): validates the kernel
    # structure bit-tightly against the reference.
    fwd_exact = jax.jit(functools.partial(
        block_forward, stride=stride,
        matmul_dtype=jnp.float32, pw_dtype=jnp.float32))
    out_exact = jax.block_until_ready(fwd_exact(x, params))
    assert out_exact.shape == (N, Cout, H // stride, W // stride), out_exact.shape
    err_exact = float(jnp.max(jnp.abs(out_exact - ref)))
    assert jnp.allclose(out_exact, ref, atol=1e-4, rtol=1e-4), err_exact

    # Default fast path (bf16 MXU operands + bf16 pw intermediate): looser
    # tolerance is expected bf16 quantization error, not a bug.
    fwd_fast = jax.jit(functools.partial(block_forward, stride=stride))
    out_fast = jax.block_until_ready(fwd_fast(x, params))
    err_fast = float(jnp.max(jnp.abs(out_fast - ref)))
    assert jnp.allclose(out_fast, ref, atol=1e-1, rtol=1e-1), err_fast

    print("KERNEL_OK")
</pallas_src>

<mosaic_0001>
module attributes {stable_mosaic.version = 11 : i64} {
  func.func @_bn1_stats_kernel(%arg0: i32, %arg1: i32, %arg2: memref<8x256xf32, #tpu.memory_space<vmem>>, %arg3: memref<8x9xf32, #tpu.memory_space<vmem>>, %arg4: memref<1x8x2xf32, #tpu.memory_space<vmem>>) attributes {dimension_semantics = [#tpu.dimension_semantics<parallel>, #tpu.dimension_semantics<arbitrary>], iteration_bounds = array<i64: 1, 1>, scalar_prefetch = 0 : i64, scratch_operands = 0 : i64, tpu.core_type = #tpu.core_type<tc>, window_params = [{transform_indices = @transform_0, window_bounds = array<i64: 8, 256>}, {pipeline_mode = #tpu.pipeline_mode<synchronous>, transform_indices = @transform_1, window_bounds = array<i64: 8, 9>}, {transform_indices = @transform_2, window_bounds = array<i64: 1, 8, 2>}]} {
    %c0 = arith.constant 0 : index
    %c0_0 = arith.constant 0 : index
    %0 = vector.load %arg2[%c0, %c0_0] : memref<8x256xf32, #tpu.memory_space<vmem>>, vector<8x256xf32>
    %c0_1 = arith.constant 0 : index
    %c0_2 = arith.constant 0 : index
    %1 = vector.load %arg3[%c0_1, %c0_2] : memref<8x9xf32, #tpu.memory_space<vmem>>, vector<8x9xf32>
    %2 = tpu.iota {dimensions = array<i32: 1>} : vector<8x256xi32>
    %c16_i32 = arith.constant 16 : i32
    %c0_i32 = arith.constant 0 : i32
    %3 = arith.cmpi eq, %c16_i32, %c0_i32 : i32
    %c1_i32 = arith.constant 1 : i32
    %4 = arith.select %3, %c1_i32, %c16_i32 : i32
    %5 = vector.broadcast %4 : i32 to vector<8x256xi32>
    %6 = arith.remsi %2, %5 : vector<8x256xi32>
    %c0_i32_3 = arith.constant 0 : i32
    %7 = vector.broadcast %c0_i32_3 : i32 to vector<8x256xi32>
    %8 = arith.cmpi ne, %6, %7 : vector<8x256xi32>
    %c0_i32_4 = arith.constant 0 : i32
    %9 = vector.broadcast %c0_i32_4 : i32 to vector<8x256xi32>
    %10 = arith.cmpi slt, %6, %9 : vector<8x256xi32>
    %c0_i32_5 = arith.constant 0 : i32
    %11 = arith.cmpi slt, %4, %c0_i32_5 : i32
    %12 = vector.broadcast %11 : i1 to vector<8x256xi1>
    %13 = vector.broadcast %12 : vector<8x256xi1> to vector<8x256xi1>
    %14 = arith.xori %10, %13 : vector<8x256xi1>
    %15 = arith.andi %14, %8 : vector<8x256xi1>
    %16 = vector.broadcast %4 : i32 to vector<8x256xi32>
    %17 = arith.addi %6, %16 : vector<8x256xi32>
    %18 = arith.select %15, %17, %6 : vector<8x256xi1>, vector<8x256xi32>
    %c15_i32 = arith.constant 15 : i32
    %19 = vector.broadcast %c15_i32 : i32 to vector<8x256xi32>
    %20 = arith.cmpi ne, %18, %19 : vector<8x256xi32>
    %cst = arith.constant 0.000000e+00 : f32
    %21 = vector.broadcast %cst : f32 to vector<8x256xf32>
    %22 = arith.select %20, %0, %21 : vector<8x256xi1>, vector<8x256xf32>
    %c0_i32_6 = arith.constant 0 : i32
    %23 = vector.broadcast %c0_i32_6 : i32 to vector<8x256xi32>
    %24 = arith.cmpi ne, %18, %23 : vector<8x256xi32>
    %cst_7 = arith.constant 0.000000e+00 : f32
    %25 = vector.broadcast %cst_7 : f32 to vector<8x256xf32>
    %26 = arith.select %24, %0, %25 : vector<8x256xi1>, vector<8x256xf32>
    %c16_i32_8 = arith.constant 16 : i32
    %27 = vector.broadcast %c16_i32_8 : i32 to vector<8x256xi32>
    %28 = arith.cmpi sge, %2, %27 : vector<8x256xi32>
    %c240_i32 = arith.constant 240 : i32
    %29 = vector.broadcast %c240_i32 : i32 to vector<8x256xi32>
    %30 = arith.cmpi slt, %2, %29 : vector<8x256xi32>
    %c1_i32_9 = arith.constant 1 : i32
    %31 = tpu.dynamic_rotate %22 by %c1_i32_9 dim 1 : vector<8x256xf32>, i32 -> vector<8x256xf32>
    %32 = vector.extract_strided_slice %1 {offsets = [0, 3], sizes = [8, 1], strides = [1, 1]} : vector<8x9xf32> to vector<8x1xf32>
    %33 = vector.broadcast %32 : vector<8x1xf32> to vector<8x256xf32>
    %34 = arith.mulf %31, %33 : vector<8x256xf32>
    %35 = vector.extract_strided_slice %1 {offsets = [0, 4], sizes = [8, 1], strides = [1, 1]} : vector<8x9xf32> to vector<8x1xf32>
    %36 = vector.broadcast %35 : vector<8x1xf32> to vector<8x256xf32>
    %37 = arith.mulf %0, %36 : vector<8x256xf32>
    %38 = arith.addf %34, %37 : vector<8x256xf32>
    %c255_i32 = arith.constant 255 : i32
    %39 = tpu.dynamic_rotate %26 by %c255_i32 dim 1 : vector<8x256xf32>, i32 -> vector<8x256xf32>
    %40 = vector.extract_strided_slice %1 {offsets = [0, 5], sizes = [8, 1], strides = [1, 1]} : vector<8x9xf32> to vector<8x1xf32>
    %41 = vector.broadcast %40 : vector<8x1xf32> to vector<8x256xf32>
    %42 = arith.mulf %39, %41 : vector<8x256xf32>
    %43 = arith.addf %38, %42 : vector<8x256xf32>
    %c17_i32 = arith.constant 17 : i32
    %44 = tpu.dynamic_rotate %22 by %c17_i32 dim 1 : vector<8x256xf32>, i32 -> vector<8x256xf32>
    %45 = vector.extract_strided_slice %1 {offsets = [0, 0], sizes = [8, 1], strides = [1, 1]} : vector<8x9xf32> to vector<8x1xf32>
    %46 = vector.broadcast %45 : vector<8x1xf32> to vector<8x256xf32>
    %47 = arith.mulf %44, %46 : vector<8x256xf32>
    %c16_i32_10 = arith.constant 16 : i32
    %48 = tpu.dynamic_rotate %0 by %c16_i32_10 dim 1 : vector<8x256xf32>, i32 -> vector<8x256xf32>
    %49 = vector.extract_strided_slice %1 {offsets = [0, 1], sizes = [8, 1], strides = [1, 1]} : vector<8x9xf32> to vector<8x1xf32>
    %50 = vector.broadcast %49 : vector<8x1xf32> to vector<8x256xf32>
    %51 = arith.mulf %48, %50 : vector<8x256xf32>
    %52 = arith.addf %47, %51 : vector<8x256xf32>
    %c15_i32_11 = arith.constant 15 : i32
    %53 = tpu.dynamic_rotate %26 by %c15_i32_11 dim 1 : vector<8x256xf32>, i32 -> vector<8x256xf32>
    %54 = vector.extract_strided_slice %1 {offsets = [0, 2], sizes = [8, 1], strides = [1, 1]} : vector<8x9xf32> to vector<8x1xf32>
    %55 = vector.broadcast %54 : vector<8x1xf32> to vector<8x256xf32>
    %56 = arith.mulf %53, %55 : vector<8x256xf32>
    %57 = arith.addf %52, %56 : vector<8x256xf32>
    %cst_12 = arith.constant 0.000000e+00 : f32
    %58 = vector.broadcast %cst_12 : f32 to vector<8x256xf32>
    %59 = arith.select %28, %57, %58 : vector<8x256xi1>, vector<8x256xf32>
    %60 = arith.addf %43, %59 : vector<8x256xf32>
    %c241_i32 = arith.constant 241 : i32
    %61 = tpu.dynamic_rotate %22 by %c241_i32 dim 1 : vector<8x256xf32>, i32 -> vector<8x256xf32>
    %62 = vector.extract_strided_slice %1 {offsets = [0, 6], sizes = [8, 1], strides = [1, 1]} : vector<8x9xf32> to vector<8x1xf32>
    %63 = vector.broadcast %62 : vector<8x1xf32> to vector<8x256xf32>
    %64 = arith.mulf %61, %63 : vector<8x256xf32>
    %c240_i32_13 = arith.constant 240 : i32
    %65 = tpu.dynamic_rotate %0 by %c240_i32_13 dim 1 : vector<8x256xf32>, i32 -> vector<8x256xf32>
    %66 = vector.extract_strided_slice %1 {offsets = [0, 7], sizes = [8, 1], strides = [1, 1]} : vector<8x9xf32> to vector<8x1xf32>
    %67 = vector.broadcast %66 : vector<8x1xf32> to vector<8x256xf32>
    %68 = arith.mulf %65, %67 : vector<8x256xf32>
    %69 = arith.addf %64, %68 : vector<8x256xf32>
    %c239_i32 = arith.constant 239 : i32
    %70 = tpu.dynamic_rotate %26 by %c239_i32 dim 1 : vector<8x256xf32>, i32 -> vector<8x256xf32>
    %71 = vector.extract_strided_slice %1 {offsets = [0, 8], sizes = [8, 1], strides = [1, 1]} : vector<8x9xf32> to vector<8x1xf32>
    %72 = vector.broadcast %71 : vector<8x1xf32> to vector<8x256xf32>
    %73 = arith.mulf %70, %72 : vector<8x256xf32>
    %74 = arith.addf %69, %73 : vector<8x256xf32>
    %cst_14 = arith.constant 0.000000e+00 : f32
    %75 = vector.broadcast %cst_14 : f32 to vector<8x256xf32>
    %76 = arith.select %30, %74, %75 : vector<8x256xi1>, vector<8x256xf32>
    %77 = arith.addf %60, %76 : vector<8x256xf32>
    %cst_15 = arith.constant dense<0.000000e+00> : vector<8xf32>
    %78 = vector.multi_reduction <add>, %77, %cst_15 [1] : vector<8x256xf32> to vector<8xf32>
    %79 = vector.shape_cast %78 : vector<8xf32> to vector<8x1xf32>
    %80 = arith.mulf %77, %77 : vector<8x256xf32>
    %cst_16 = arith.constant dense<0.000000e+00> : vector<8xf32>
    %81 = vector.multi_reduction <add>, %80, %cst_16 [1] : vector<8x256xf32> to vector<8xf32>
    %82 = vector.shape_cast %81 : vector<8xf32> to vector<8x1xf32>
    %83 = tpu.concatenate %79, %82 in 1 : vector<8x1xf32>, vector<8x1xf32> -> vector<8x2xf32>
    %c0_i32_17 = arith.constant 0 : i32
    %84 = arith.cmpi eq, %arg1, %c0_i32_17 : i32
    %85 = arith.extui %84 : i1 to i32
    %c0_i32_18 = arith.constant 0 : i32
    %86 = arith.cmpi ne, %85, %c0_i32_18 : i32
    scf.if %86 {
      %cst_25 = arith.constant 0.000000e+00 : f32
      %91 = vector.broadcast %cst_25 : f32 to vector<1x8x2xf32>
      %c0_26 = arith.constant 0 : index
      %c0_27 = arith.constant 0 : index
      %c0_28 = arith.constant 0 : index
      %92 = vector.load %arg4[%c0_26, %c0_27, %c0_28] : memref<1x8x2xf32, #tpu.memory_space<vmem>>, vector<1x8x2xf32>
      tpu.vector_store %arg4[%c0_26, %c0_27, %c0_28], %91 {strides = array<i32>} : memref<1x8x2xf32, #tpu.memory_space<vmem>>, vector<1x8x2xf32>,
    } else {
    }
    %c0_19 = arith.constant 0 : index
    %c0_20 = arith.constant 0 : index
    %c0_21 = arith.constant 0 : index
    %87 = vector.load %arg4[%c0_19, %c0_20, %c0_21] : memref<1x8x2xf32, #tpu.memory_space<vmem>>, vector<1x8x2xf32>
    %88 = vector.shape_cast %83 : vector<8x2xf32> to vector<1x8x2xf32>
    %89 = arith.addf %87, %88 : vector<1x8x2xf32>
    %c0_22 = arith.constant 0 : index
    %c0_23 = arith.constant 0 : index
    %c0_24 = arith.constant 0 : index
    %90 = vector.load %arg4[%c0_22, %c0_23, %c0_24] : memref<1x8x2xf32, #tpu.memory_space<vmem>>, vector<1x8x2xf32>
    tpu.vector_store %arg4[%c0_22, %c0_23, %c0_24], %89 {strides = array<i32>} : memref<1x8x2xf32, #tpu.memory_space<vmem>>, vector<1x8x2xf32>,
    return
  }
  func.func @transform_0(%arg0: i32, %arg1: i32) -> (i32, i32) {
    %c1_i32 = arith.constant 1 : i32
    %0 = arith.muli %arg0, %c1_i32 : i32
    %1 = arith.addi %0, %arg1 : i32
    %c0_i32 = arith.constant 0 : i32
    %c0_i32_0 = arith.constant 0 : i32
    return %1, %c0_i32 : i32, i32
  }
  func.func @transform_1(%arg0: i32, %arg1: i32) -> (i32, i32) {
    %c0_i32 = arith.constant 0 : i32
    %c0_i32_0 = arith.constant 0 : i32
    %c0_i32_1 = arith.constant 0 : i32
    return %c0_i32, %c0_i32_0 : i32, i32
  }
  func.func @transform_2(%arg0: i32, %arg1: i32) -> (i32, i32, i32) {
    %c0_i32 = arith.constant 0 : i32
    %c0_i32_0 = arith.constant 0 : i32
    %c0_i32_1 = arith.constant 0 : i32
    return %arg0, %c0_i32, %c0_i32_0 : i32, i32, i32
  }
}

module attributes {stable_mosaic.version = 11 : i64} {
  func.func @_pointwise_kernel(%arg0: i32, %arg1: i32, %arg2: memref<8x256xf32, #tpu.memory_space<vmem>>, %arg3: memref<8x9xf32, #tpu.memory_space<vmem>>, %arg4: memref<8x2xf32, #tpu.memory_space<vmem>>, %arg5: memref<8x4xf32, #tpu.memory_space<vmem>>, %arg6: memref<16x256xf32, #tpu.memory_space<vmem>>, %arg7: memref<1x8x2xf32, #tpu.memory_space<vmem>>, %arg8: memref<4x512xf32, #tpu.memory_space<vmem>>) attributes {dimension_semantics = [#tpu.dimension_semantics<parallel>, #tpu.dimension_semantics<arbitrary>], iteration_bounds = array<i64: 1, 1>, scalar_prefetch = 0 : i64, scratch_operands = 1 : i64, tpu.core_type = #tpu.core_type<tc>, window_params = [{transform_indices = @transform_0, window_bounds = array<i64: 8, 256>}, {pipeline_mode = #tpu.pipeline_mode<synchronous>, transform_indices = @transform_1, window_bounds = array<i64: 8, 9>}, {pipeline_mode = #tpu.pipeline_mode<synchronous>, transform_indices = @transform_2, window_bounds = array<i64: 8, 2>}, {pipeline_mode = #tpu.pipeline_mode<synchronous>, transform_indices = @transform_3, window_bounds = array<i64: 8, 4>}, {transform_indices = @transform_4, window_bounds = array<i64: 16, 256>}, {transform_indices = @transform_5, window_bounds = array<i64: 1, 8, 2>}]} {
    %c0 = arith.constant 0 : index
    %c0_0 = arith.constant 0 : index
    %0 = vector.load %arg2[%c0, %c0_0] : memref<8x256xf32, #tpu.memory_space<vmem>>, vector<8x256xf32>
    %c0_1 = arith.constant 0 : index
    %c0_2 = arith.constant 0 : index
    %1 = vector.load %arg3[%c0_1, %c0_2] : memref<8x9xf32, #tpu.memory_space<vmem>>, vector<8x9xf32>
    %2 = tpu.iota {dimensions = array<i32: 1>} : vector<8x256xi32>
    %c16_i32 = arith.constant 16 : i32
    %c0_i32 = arith.constant 0 : i32
    %3 = arith.cmpi eq, %c16_i32, %c0_i32 : i32
    %c1_i32 = arith.constant 1 : i32
    %4 = arith.select %3, %c1_i32, %c16_i32 : i32
    %5 = vector.broadcast %4 : i32 to vector<8x256xi32>
    %6 = arith.remsi %2, %5 : vector<8x256xi32>
    %c0_i32_3 = arith.constant 0 : i32
    %7 = vector.broadcast %c0_i32_3 : i32 to vector<8x256xi32>
    %8 = arith.cmpi ne, %6, %7 : vector<8x256xi32>
    %c0_i32_4 = arith.constant 0 : i32
    %9 = vector.broadcast %c0_i32_4 : i32 to vector<8x256xi32>
    %10 = arith.cmpi slt, %6, %9 : vector<8x256xi32>
    %c0_i32_5 = arith.constant 0 : i32
    %11 = arith.cmpi slt, %4, %c0_i32_5 : i32
    %12 = vector.broadcast %11 : i1 to vector<8x256xi1>
    %13 = vector.broadcast %12 : vector<8x256xi1> to vector<8x256xi1>
    %14 = arith.xori %10, %13 : vector<8x256xi1>
    %15 = arith.andi %14, %8 : vector<8x256xi1>
    %16 = vector.broadcast %4 : i32 to vector<8x256xi32>
    %17 = arith.addi %6, %16 : vector<8x256xi32>
    %18 = arith.select %15, %17, %6 : vector<8x256xi1>, vector<8x256xi32>
    %c15_i32 = arith.constant 15 : i32
    %19 = vector.broadcast %c15_i32 : i32 to vector<8x256xi32>
    %20 = arith.cmpi ne, %18, %19 : vector<8x256xi32>
    %cst = arith.constant 0.000000e+00 : f32
    %21 = vector.broadcast %cst : f32 to vector<8x256xf32>
    %22 = arith.select %20, %0, %21 : vector<8x256xi1>, vector<8x256xf32>
    %c0_i32_6 = arith.constant 0 : i32
    %23 = vector.broadcast %c0_i32_6 : i32 to vector<8x256xi32>
    %24 = arith.cmpi ne, %18, %23 : vector<8x256xi32>
    %cst_7 = arith.constant 0.000000e+00 : f32
    %25 = vector.broadcast %cst_7 : f32 to vector<8x256xf32>
    %26 = arith.select %24, %0, %25 : vector<8x256xi1>, vector<8x256xf32>
    %c16_i32_8 = arith.constant 16 : i32
    %27 = vector.broadcast %c16_i32_8 : i32 to vector<8x256xi32>
    %28 = arith.cmpi sge, %2, %27 : vector<8x256xi32>
    %c240_i32 = arith.constant 240 : i32
    %29 = vector.broadcast %c240_i32 : i32 to vector<8x256xi32>
    %30 = arith.cmpi slt, %2, %29 : vector<8x256xi32>
    %c1_i32_9 = arith.constant 1 : i32
    %31 = tpu.dynamic_rotate %22 by %c1_i32_9 dim 1 : vector<8x256xf32>, i32 -> vector<8x256xf32>
    %32 = vector.extract_strided_slice %1 {offsets = [0, 3], sizes = [8, 1], strides = [1, 1]} : vector<8x9xf32> to vector<8x1xf32>
    %33 = vector.broadcast %32 : vector<8x1xf32> to vector<8x256xf32>
    %34 = arith.mulf %31, %33 : vector<8x256xf32>
    %35 = vector.extract_strided_slice %1 {offsets = [0, 4], sizes = [8, 1], strides = [1, 1]} : vector<8x9xf32> to vector<8x1xf32>
    %36 = vector.broadcast %35 : vector<8x1xf32> to vector<8x256xf32>
    %37 = arith.mulf %0, %36 : vector<8x256xf32>
    %38 = arith.addf %34, %37 : vector<8x256xf32>
    %c255_i32 = arith.constant 255 : i32
    %39 = tpu.dynamic_rotate %26 by %c255_i32 dim 1 : vector<8x256xf32>, i32 -> vector<8x256xf32>
    %40 = vector.extract_strided_slice %1 {offsets = [0, 5], sizes = [8, 1], strides = [1, 1]} : vector<8x9xf32> to vector<8x1xf32>
    %41 = vector.broadcast %40 : vector<8x1xf32> to vector<8x256xf32>
    %42 = arith.mulf %39, %41 : vector<8x256xf32>
    %43 = arith.addf %38, %42 : vector<8x256xf32>
    %c17_i32 = arith.constant 17 : i32
    %44 = tpu.dynamic_rotate %22 by %c17_i32 dim 1 : vector<8x256xf32>, i32 -> vector<8x256xf32>
    %45 = vector.extract_strided_slice %1 {offsets = [0, 0], sizes = [8, 1], strides = [1, 1]} : vector<8x9xf32> to vector<8x1xf32>
    %46 = vector.broadcast %45 : vector<8x1xf32> to vector<8x256xf32>
    %47 = arith.mulf %44, %46 : vector<8x256xf32>
    %c16_i32_10 = arith.constant 16 : i32
    %48 = tpu.dynamic_rotate %0 by %c16_i32_10 dim 1 : vector<8x256xf32>, i32 -> vector<8x256xf32>
    %49 = vector.extract_strided_slice %1 {offsets = [0, 1], sizes = [8, 1], strides = [1, 1]} : vector<8x9xf32> to vector<8x1xf32>
    %50 = vector.broadcast %49 : vector<8x1xf32> to vector<8x256xf32>
    %51 = arith.mulf %48, %50 : vector<8x256xf32>
    %52 = arith.addf %47, %51 : vector<8x256xf32>
    %c15_i32_11 = arith.constant 15 : i32
    %53 = tpu.dynamic_rotate %26 by %c15_i32_11 dim 1 : vector<8x256xf32>, i32 -> vector<8x256xf32>
    %54 = vector.extract_strided_slice %1 {offsets = [0, 2], sizes = [8, 1], strides = [1, 1]} : vector<8x9xf32> to vector<8x1xf32>
    %55 = vector.broadcast %54 : vector<8x1xf32> to vector<8x256xf32>
    %56 = arith.mulf %53, %55 : vector<8x256xf32>
    %57 = arith.addf %52, %56 : vector<8x256xf32>
    %cst_12 = arith.constant 0.000000e+00 : f32
    %58 = vector.broadcast %cst_12 : f32 to vector<8x256xf32>
    %59 = arith.select %28, %57, %58 : vector<8x256xi1>, vector<8x256xf32>
    %60 = arith.addf %43, %59 : vector<8x256xf32>
    %c241_i32 = arith.constant 241 : i32
    %61 = tpu.dynamic_rotate %22 by %c241_i32 dim 1 : vector<8x256xf32>, i32 -> vector<8x256xf32>
    %62 = vector.extract_strided_slice %1 {offsets = [0, 6], sizes = [8, 1], strides = [1, 1]} : vector<8x9xf32> to vector<8x1xf32>
    %63 = vector.broadcast %62 : vector<8x1xf32> to vector<8x256xf32>
    %64 = arith.mulf %61, %63 : vector<8x256xf32>
    %c240_i32_13 = arith.constant 240 : i32
    %65 = tpu.dynamic_rotate %0 by %c240_i32_13 dim 1 : vector<8x256xf32>, i32 -> vector<8x256xf32>
    %66 = vector.extract_strided_slice %1 {offsets = [0, 7], sizes = [8, 1], strides = [1, 1]} : vector<8x9xf32> to vector<8x1xf32>
    %67 = vector.broadcast %66 : vector<8x1xf32> to vector<8x256xf32>
    %68 = arith.mulf %65, %67 : vector<8x256xf32>
    %69 = arith.addf %64, %68 : vector<8x256xf32>
    %c239_i32 = arith.constant 239 : i32
    %70 = tpu.dynamic_rotate %26 by %c239_i32 dim 1 : vector<8x256xf32>, i32 -> vector<8x256xf32>
    %71 = vector.extract_strided_slice %1 {offsets = [0, 8], sizes = [8, 1], strides = [1, 1]} : vector<8x9xf32> to vector<8x1xf32>
    %72 = vector.broadcast %71 : vector<8x1xf32> to vector<8x256xf32>
    %73 = arith.mulf %70, %72 : vector<8x256xf32>
    %74 = arith.addf %69, %73 : vector<8x256xf32>
    %cst_14 = arith.constant 0.000000e+00 : f32
    %75 = vector.broadcast %cst_14 : f32 to vector<8x256xf32>
    %76 = arith.select %30, %74, %75 : vector<8x256xi1>, vector<8x256xf32>
    %77 = arith.addf %60, %76 : vector<8x256xf32>
    %c0_15 = arith.constant 0 : index
    %c0_16 = arith.constant 0 : index
    %78 = vector.load %arg4[%c0_15, %c0_16] : memref<8x2xf32, #tpu.memory_space<vmem>>, vector<8x2xf32>
    %79 = vector.extract_strided_slice %78 {offsets = [0, 0], sizes = [8, 1], strides = [1, 1]} : vector<8x2xf32> to vector<8x1xf32>
    %80 = vector.broadcast %79 : vector<8x1xf32> to vector<8x256xf32>
    %81 = arith.mulf %77, %80 : vector<8x256xf32>
    %82 = vector.extract_strided_slice %78 {offsets = [0, 1], sizes = [8, 1], strides = [1, 1]} : vector<8x2xf32> to vector<8x1xf32>
    %83 = vector.broadcast %82 : vector<8x1xf32> to vector<8x256xf32>
    %84 = arith.addf %81, %83 : vector<8x256xf32>
    %cst_17 = arith.constant 0.000000e+00 : f32
    %85 = vector.broadcast %cst_17 : f32 to vector<8x256xf32>
    %86 = arith.maximumf %84, %85 : vector<8x256xf32>
    %87 = vector.extract_strided_slice %86 {offsets = [0, 0], sizes = [4, 256], strides = [1, 1]} : vector<8x256xf32> to vector<4x256xf32>
    %c0_18 = arith.constant 0 : index
    %c0_19 = arith.constant 0 : index
    %88 = vector.load %arg8[%c0_18, %c0_19] : memref<4x512xf32, #tpu.memory_space<vmem>>, vector<4x256xf32>
    tpu.vector_store %arg8[%c0_18, %c0_19], %87 {strides = array<i32>} : memref<4x512xf32, #tpu.memory_space<vmem>>, vector<4x256xf32>,
    %89 = vector.extract_strided_slice %86 {offsets = [4, 0], sizes = [4, 256], strides = [1, 1]} : vector<8x256xf32> to vector<4x256xf32>
    %c0_20 = arith.constant 0 : index
    %c256 = arith.constant 256 : index
    %90 = vector.load %arg8[%c0_20, %c256] : memref<4x512xf32, #tpu.memory_space<vmem>>, vector<4x256xf32>
    tpu.vector_store %arg8[%c0_20, %c256], %89 {strides = array<i32>} : memref<4x512xf32, #tpu.memory_space<vmem>>, vector<4x256xf32>,
    %c0_21 = arith.constant 0 : index
    %c0_22 = arith.constant 0 : index
    %91 = vector.load %arg5[%c0_21, %c0_22] : memref<8x4xf32, #tpu.memory_space<vmem>>, vector<8x4xf32>
    %c0_23 = arith.constant 0 : index
    %c0_24 = arith.constant 0 : index
    %92 = vector.load %arg8[%c0_23, %c0_24] : memref<4x512xf32, #tpu.memory_space<vmem>>, vector<4x512xf32>
    %cst_25 = arith.constant dense<0.000000e+00> : vector<8x512xf32>
    %93 = tpu.matmul %91, %92, %cst_25 {dimension_numbers = #tpu.dot_dimension_numbers<[1], [0], [0], [1], [0, 0, 1, 1], [], []>} : vector<8x4xf32>, vector<4x512xf32>, vector<8x512xf32> -> vector<8x512xf32>
    %94 = vector.extract_strided_slice %93 {offsets = [0, 0], sizes = [8, 256], strides = [1, 1]} : vector<8x512xf32> to vector<8x256xf32>
    %c0_26 = arith.constant 0 : index
    %c0_27 = arith.constant 0 : index
    %95 = vector.load %arg6[%c0_26, %c0_27] : memref<16x256xf32, #tpu.memory_space<vmem>>, vector<8x256xf32>
    tpu.vector_store %arg6[%c0_26, %c0_27], %94 {strides = array<i32>} : memref<16x256xf32, #tpu.memory_space<vmem>>, vector<8x256xf32>,
    %96 = vector.extract_strided_slice %93 {offsets = [0, 256], sizes = [8, 256], strides = [1, 1]} : vector<8x512xf32> to vector<8x256xf32>
    %c8 = arith.constant 8 : index
    %c0_28 = arith.constant 0 : index
    %97 = vector.load %arg6[%c8, %c0_28] : memref<16x256xf32, #tpu.memory_space<vmem>>, vector<8x256xf32>
    tpu.vector_store %arg6[%c8, %c0_28], %96 {strides = array<i32>} : memref<16x256xf32, #tpu.memory_space<vmem>>, vector<8x256xf32>,
    %cst_29 = arith.constant dense<0.000000e+00> : vector<8xf32>
    %98 = vector.multi_reduction <add>, %93, %cst_29 [1] : vector<8x512xf32> to vector<8xf32>
    %99 = vector.shape_cast %98 : vector<8xf32> to vector<8x1xf32>
    %100 = arith.mulf %93, %93 : vector<8x512xf32>
    %cst_30 = arith.constant dense<0.000000e+00> : vector<8xf32>
    %101 = vector.multi_reduction <add>, %100, %cst_30 [1] : vector<8x512xf32> to vector<8xf32>
    %102 = vector.shape_cast %101 : vector<8xf32> to vector<8x1xf32>
    %103 = tpu.concatenate %99, %102 in 1 : vector<8x1xf32>, vector<8x1xf32> -> vector<8x2xf32>
    %c0_i32_31 = arith.constant 0 : i32
    %104 = arith.cmpi eq, %arg1, %c0_i32_31 : i32
    %105 = arith.extui %104 : i1 to i32
    %c0_i32_32 = arith.constant 0 : i32
    %106 = arith.cmpi ne, %105, %c0_i32_32 : i32
    scf.if %106 {
      %cst_39 = arith.constant 0.000000e+00 : f32
      %111 = vector.broadcast %cst_39 : f32 to vector<1x8x2xf32>
      %c0_40 = arith.constant 0 : index
      %c0_41 = arith.constant 0 : index
      %c0_42 = arith.constant 0 : index
      %112 = vector.load %arg7[%c0_40, %c0_41, %c0_42] : memref<1x8x2xf32, #tpu.memory_space<vmem>>, vector<1x8x2xf32>
      tpu.vector_store %arg7[%c0_40, %c0_41, %c0_42], %111 {strides = array<i32>} : memref<1x8x2xf32, #tpu.memory_space<vmem>>, vector<1x8x2xf32>,
    } else {
    }
    %c0_33 = arith.constant 0 : index
    %c0_34 = arith.constant 0 : index
    %c0_35 = arith.constant 0 : index
    %107 = vector.load %arg7[%c0_33, %c0_34, %c0_35] : memref<1x8x2xf32, #tpu.memory_space<vmem>>, vector<1x8x2xf32>
    %108 = vector.shape_cast %103 : vector<8x2xf32> to vector<1x8x2xf32>
    %109 = arith.addf %107, %108 : vector<1x8x2xf32>
    %c0_36 = arith.constant 0 : index
    %c0_37 = arith.constant 0 : index
    %c0_38 = arith.constant 0 : index
    %110 = vector.load %arg7[%c0_36, %c0_37, %c0_38] : memref<1x8x2xf32, #tpu.memory_space<vmem>>, vector<1x8x2xf32>
    tpu.vector_store %arg7[%c0_36, %c0_37, %c0_38], %109 {strides = array<i32>} : memref<1x8x2xf32, #tpu.memory_space<vmem>>, vector<1x8x2xf32>,
    return
  }
  func.func @transform_0(%arg0: i32, %arg1: i32) -> (i32, i32) {
    %c1_i32 = arith.constant 1 : i32
    %0 = arith.muli %arg0, %c1_i32 : i32
    %1 = arith.addi %0, %arg1 : i32
    %c0_i32 = arith.constant 0 : i32
    %c0_i32_0 = arith.constant 0 : i32
    return %1, %c0_i32 : i32, i32
  }
  func.func @transform_1(%arg0: i32, %arg1: i32) -> (i32, i32) {
    %c0_i32 = arith.constant 0 : i32
    %c0_i32_0 = arith.constant 0 : i32
    %c0_i32_1 = arith.constant 0 : i32
    return %c0_i32, %c0_i32_0 : i32, i32
  }
  func.func @transform_2(%arg0: i32, %arg1: i32) -> (i32, i32) {
    %c0_i32 = arith.constant 0 : i32
    %c0_i32_0 = arith.constant 0 : i32
    %c0_i32_1 = arith.constant 0 : i32
    return %c0_i32, %c0_i32_0 : i32, i32
  }
  func.func @transform_3(%arg0: i32, %arg1: i32) -> (i32, i32) {
    %c0_i32 = arith.constant 0 : i32
    %c0_i32_0 = arith.constant 0 : i32
    %c0_i32_1 = arith.constant 0 : i32
    return %c0_i32, %c0_i32_0 : i32, i32
  }
  func.func @transform_4(%arg0: i32, %arg1: i32) -> (i32, i32) {
    %c1_i32 = arith.constant 1 : i32
    %0 = arith.muli %arg0, %c1_i32 : i32
    %1 = arith.addi %0, %arg1 : i32
    %c0_i32 = arith.constant 0 : i32
    %c0_i32_0 = arith.constant 0 : i32
    return %1, %c0_i32 : i32, i32
  }
  func.func @transform_5(%arg0: i32, %arg1: i32) -> (i32, i32, i32) {
    %c0_i32 = arith.constant 0 : i32
    %c0_i32_0 = arith.constant 0 : i32
    %c0_i32_1 = arith.constant 0 : i32
    return %arg0, %c0_i32, %c0_i32_0 : i32, i32, i32
  }
}

module attributes {stable_mosaic.version = 11 : i64} {
  func.func @_bn2_kernel(%arg0: i32, %arg1: memref<16x256xf32, #tpu.memory_space<vmem>>, %arg2: memref<16x2xf32, #tpu.memory_space<vmem>>, %arg3: memref<16x256xf32, #tpu.memory_space<vmem>>) attributes {dimension_semantics = [#tpu.dimension_semantics<parallel>], iteration_bounds = array<i64: 1>, scalar_prefetch = 0 : i64, scratch_operands = 0 : i64, tpu.core_type = #tpu.core_type<tc>, window_params = [{transform_indices = @transform_0, window_bounds = array<i64: 16, 256>}, {pipeline_mode = #tpu.pipeline_mode<synchronous>, transform_indices = @transform_1, window_bounds = array<i64: 16, 2>}, {transform_indices = @transform_2, window_bounds = array<i64: 16, 256>}]} {
    %c0 = arith.constant 0 : index
    %c0_0 = arith.constant 0 : index
    %0 = vector.load %arg1[%c0, %c0_0] : memref<16x256xf32, #tpu.memory_space<vmem>>, vector<16x256xf32>
    %c0_1 = arith.constant 0 : index
    %c0_2 = arith.constant 0 : index
    %1 = vector.load %arg2[%c0_1, %c0_2] : memref<16x2xf32, #tpu.memory_space<vmem>>, vector<16x2xf32>
    %2 = vector.extract_strided_slice %1 {offsets = [0, 0], sizes = [16, 1], strides = [1, 1]} : vector<16x2xf32> to vector<16x1xf32>
    %3 = vector.broadcast %2 : vector<16x1xf32> to vector<16x256xf32>
    %4 = arith.mulf %0, %3 : vector<16x256xf32>
    %5 = vector.extract_strided_slice %1 {offsets = [0, 1], sizes = [16, 1], strides = [1, 1]} : vector<16x2xf32> to vector<16x1xf32>
    %6 = vector.broadcast %5 : vector<16x1xf32> to vector<16x256xf32>
    %7 = arith.addf %4, %6 : vector<16x256xf32>
    %cst = arith.constant 0.000000e+00 : f32
    %8 = vector.broadcast %cst : f32 to vector<16x256xf32>
    %9 = arith.maximumf %7, %8 : vector<16x256xf32>
    %c0_3 = arith.constant 0 : index
    %c0_4 = arith.constant 0 : index
    %10 = vector.load %arg3[%c0_3, %c0_4] : memref<16x256xf32, #tpu.memory_space<vmem>>, vector<16x256xf32>
    tpu.vector_store %arg3[%c0_3, %c0_4], %9 {strides = array<i32>} : memref<16x256xf32, #tpu.memory_space<vmem>>, vector<16x256xf32>,
    return
  }
  func.func @transform_0(%arg0: i32) -> (i32, i32) {
    %c0_i32 = arith.constant 0 : i32
    %c0_i32_0 = arith.constant 0 : i32
    return %arg0, %c0_i32 : i32, i32
  }
  func.func @transform_1(%arg0: i32) -> (i32, i32) {
    %c0_i32 = arith.constant 0 : i32
    %c0_i32_0 = arith.constant 0 : i32
    %c0_i32_1 = arith.constant 0 : i32
    return %c0_i32, %c0_i32_0 : i32, i32
  }
  func.func @transform_2(%arg0: i32) -> (i32, i32) {
    %c0_i32 = arith.constant 0 : i32
    %c0_i32_0 = arith.constant 0 : i32
    return %arg0, %c0_i32 : i32, i32
  }
}

</mosaic_0001>

<bundles_post_ra>
// kernel: block_forward.5
= control target key start
LH: loop header
LB: loop body
LE: loop exit
PB: predicated region body
PF: predicated region fallthrough
CT: control target
= control target key end

     0   :  { %v60_v0 = vmov 1   ;;  %v61_v1 = vmov 0   ;;  %s107_s1 = inlined_call_operand.vmem [shape: f32[16,2], index: 1, kind: input, shape index: {}]   ;;  %s108_s0 = inlined_call_operand.vmem [shape: f32[16,256], index: 0, kind: input, shape index: {}]   ;;  %s109_s2 = inlined_call_operand.vmem [shape: f32[16,256], index: 2, kind: output, shape index: {}]  }
   0x1   :  { %58 = vset.pattern.permute.xlu1 %v60_v0  ;;  %57 = vset.pattern.permute.xlu0 %v61_v1  ;;  %v15_v2 = vld [vmem:[%s107_s1] sm:$0xff]  ;;  %v16_v3 = vld [vmem:[%s107_s1 + $0x8] sm:$0xff]  ;;  %v13_v14 = vld [vmem:[%s108_s0 + $0x10] sm:$0xff] }
   0x2   :  { %32 = vperm.xlu1 %58, %v15_v2   ;;  %19 = vperm.xlu0 %57, %v15_v2   ;;  %v11_v4 = vld [vmem:[%s108_s0] sm:$0xff]  ;;  %v12_v5 = vld [vmem:[%s108_s0 + $0x8] sm:$0xff]  ;;  %v14_v15 = vld [vmem:[%s108_s0 + $0x18] sm:$0xff] }
   0xa   :  { %36 = vperm.xlu1 %58, %v16_v3   ;;  %24 = vperm.xlu0 %57, %v16_v3  }
  0x12   :  { %59 = vset.pattern.permute.xlu0 %v60_v0 }
  0x74   :  { %v33_v6 = vpop.permute.xlu1 %32  ;;  %v20_v7 = vpop.permute.xlu0 %19 }
  0x75   :  { %v27_v8 = vmul.f32 %v20_v7, %v11_v4  ;;  %v28_v9 = vmul.f32 %v20_v7, %v12_v5 }
  0x77   :  { %v39_v10 = vadd.f32 %v33_v6, %v27_v8  ;;  %v40_v11 = vadd.f32 %v33_v6, %v28_v9 }
  0x79   :  { %v43_v12 = vmax.f32 %v39_v10, 0.0  ;;  %v44_v13 = vmax.f32 %v40_v11, 0.0 }
  0x7b   :  { %47 = vst [vmem:[%s109_s2] sm:$0xff] %v43_v12 }
  0x7c   :  { %48 = vst [vmem:[%s109_s2 + $0x8] sm:$0xff] %v44_v13  ;;  %v25_v16 = vpop.permute.xlu0 %24  ;;  %v37_v19 = vpop.permute.xlu1 %36 }
  0x7d   :  { %v29_v17 = vmul.f32 %v25_v16, %v13_v14  ;;  %v30_v18 = vmul.f32 %v25_v16, %v14_v15 }
  0x7f   :  { %v41_v20 = vadd.f32 %v37_v19, %v29_v17  ;;  %v42_v21 = vadd.f32 %v37_v19, %v30_v18 }
  0x81   :  { %v45_v22 = vmax.f32 %v41_v20, 0.0  ;;  %v46_v23 = vmax.f32 %v42_v21, 0.0 }
  0x83   :  { %49 = vst [vmem:[%s109_s2 + $0x10] sm:$0xff] %v45_v22 }
  0x84   :  { %50 = vst [vmem:[%s109_s2 + $0x18] sm:$0xff] %v46_v23 }

// kernel: block_forward.3
= control target key start
LH: loop header
LB: loop body
LE: loop exit
PB: predicated region body
PF: predicated region fallthrough
CT: control target
= control target key end

     0   :  { %v34_v0 = vlaneseq  ;;  %v262_v1 = vmov 3   ;;  %v263_v4 = vmov 0   ;;  %s265_s13 = smov 127   ;;  %v266_v11 = vmov 4   ;;  %s267_s16 = smov 17   ;;  %s381_s1 = inlined_call_operand.vmem [shape: f32[8,9], index: 1, kind: input, shape index: {}]   ;;  %s382_s0 = inlined_call_operand.vmem [shape: f32[8,256], index: 0, kind: input, shape index: {}]   ;;  %s383_s2 = inlined_call_operand.vmem [shape: f32[1,8,2], index: 2, kind: output, shape index: {}]  }
   0x1   :  { %252 = vset.pattern.permute.xlu1 %v262_v1  ;;  %v298_v2 = vld [vmem:[%s381_s1] sm:$0xff]  ;;  %254 = vset.pattern.permute.xlu0 %v263_v4  ;;  %s264_s1 = smov 1   ;;  %v319_v12 = vld [vmem:[%s382_s0 + $0x8] sm:$0xff]  ;;  %s268_s17 = smov 16   ;;  %v269_v14 = vmov 1   ;;  %v270_v15 = vmov 6  }
   0x2   :  { %82 = vperm.xlu1 %252, %v298_v2   ;;  %v301_v3 = vand.u32 127, %v34_v0  ;;  %v306_v5 = vld [vmem:[%s382_s0] sm:$0xff]  ;;  %257 = vset.pattern.permute.xlu2 %v270_v15  ;;  %s271_s0 = smov 15   ;;  %v272_v17 = vmov 2   ;;  %s273_s18 = smov 113   ;;  %v274_v18 = vmov 7  }
   0x3   :  { %s275_s19 = smov 112   ;;  %v276_v19 = vmov 5   ;;  %s277_s20 = smov 111   ;;  %v278_v20 = vmov 8   ;;  %vm218_vm14 = vcmask 15360   ;;  %vm212_vm15 = vcmask 7168  }
   0x4   :  { %v41_v6 = vand.u32 15, %v301_v3  ;;  %v310_v7 = vadd.s32 128, %v301_v3  ;;  %vm77_vm4 = vcmp.lt.s32.totalorder %v301_v3, 1  ;;  %vm114_vm5 = vcmp.lt.s32.totalorder %v301_v3, 17 }
   0x5   :  { %vm127_vm6 = vcmp.lt.s32.totalorder %v301_v3, 16  ;;  %vm142_vm7 = vcmp.lt.s32.totalorder %v301_v3, 15  ;;  %vm161_vm8 = vcmp.lt.s32.totalorder %v301_v3, 113  ;;  %vm99_vm9 = vcmp.lt.s32.totalorder %v301_v3, 127 }
   0x6   :  { %vm61_vm0 = vcmp.ne.s32.totalorder %v41_v6, 15  ;;  %v48_v8 = vand.u32 15, %v310_v7  ;;  %vm65_vm1 = vcmp.ne.s32.totalorder %v41_v6, 0  ;;  %vm174_vm10 = vcmp.lt.s32.totalorder %v301_v3, 112 }
   0x7   :  { %v63_v9 = vsel %vm61_vm0, %v306_v5, 0.0  ;;  %v67_v10 = vsel %vm65_vm1, %v306_v5, 0.0  ;;  %vm189_vm11 = vcmp.lt.s32.totalorder %v301_v3, 111  ;;  %vm69_vm12 = vcmp.ge.s32.totalorder %v301_v3, 16 }
   0x8   :  { %73 = vrot.lane.b32.xlu0 %v63_v9, %s264_s1  ;;  %95 = vrot.lane.b32.xlu2 %v67_v10, %s265_s13  ;;  %vm62_vm2 = vcmp.ne.s32.totalorder %v48_v8, 15  ;;  %vm66_vm3 = vcmp.ne.s32.totalorder %v48_v8, 0  ;;  %vm72_vm13 = vcmp.lt.s32.totalorder %v310_v7, 240 }
   0x9   :  { %v64_v13 = vsel %vm62_vm2, %v319_v12, 0.0  ;;  %v68_v16 = vsel %vm66_vm3, %v319_v12, 0.0 }
   0xa   :  { %253 = vset.pattern.permute.xlu1 %v266_v11 }
   0xb   :  { %88 = vperm.xlu1 %253, %v298_v2  }
  0x10   :  { %75 = vrot.lane.b32.xlu0 %v64_v13, %s264_s1  ;;  %110 = vrot.lane.b32.xlu2 %v63_v9, %s267_s16 }
  0x13   :  { %123 = vrot.lane.b32.xlu1 %v306_v5, %s268_s17 }
  0x14   :  { %255 = vset.pattern.permute.xlu1 %v269_v14 }
  0x18   :  { %112 = vrot.lane.b32.xlu0 %v64_v13, %s267_s16  ;;  %125 = vrot.lane.b32.xlu2 %v319_v12, %s268_s17 }
  0x1b   :  { %131 = vperm.xlu1 %255, %v298_v2  }
  0x20   :  { %118 = vperm.xlu0 %254, %v298_v2   ;;  %138 = vrot.lane.b32.xlu2 %v67_v10, %s271_s0 }
  0x23   :  { %140 = vrot.lane.b32.xlu1 %v68_v16, %s271_s0 }
  0x24   :  { %256 = vset.pattern.permute.xlu1 %v272_v17 }
  0x28   :  { %159 = vrot.lane.b32.xlu0 %v64_v13, %s273_s18  ;;  %157 = vrot.lane.b32.xlu2 %v63_v9, %s273_s18 }
  0x29   :  { %258 = vset.pattern.permute.xlu0 %v274_v18 }
  0x2b   :  { %170 = vrot.lane.b32.xlu1 %v306_v5, %s275_s19 }
  0x30   :  { %97 = vrot.lane.b32.xlu0 %v68_v16, %s265_s13  ;;  %172 = vrot.lane.b32.xlu2 %v319_v12, %s275_s19 }
  0x33   :  { %146 = vperm.xlu1 %256, %v298_v2  }
  0x38   :  { %178 = vperm.xlu0 %258, %v298_v2   ;;  %165 = vperm.xlu2 %257, %v298_v2  }
  0x3b   :  { %259 = vset.pattern.permute.xlu1 %v276_v19 }
  0x3c   :  { %103 = vperm.xlu1 %259, %v298_v2  }
  0x40   :  { %185 = vrot.lane.b32.xlu2 %v67_v10, %s277_s20  ;;  %261 = vset.pattern.permute.xlu0 %v278_v20 }
  0x41   :  { %260 = vset.pattern.permute.xlu2 %v278_v20 }
  0x44   :  { %187 = vrot.lane.b32.xlu1 %v68_v16, %s277_s20 }
  0x48   :  { %193 = vperm.xlu2 %260, %v298_v2  }
  0x62   :  { %v96_v21 = vpop.permute.xlu2 %95 }
  0x6a   :  { %v111_v22 = vpop.permute.xlu2 %110 }
  0x72   :  { %v126_v25 = vpop.permute.xlu2 %125 }
  0x74   :  { %v83_v23 = vpop.permute.xlu1 %82 }
  0x7a   :  { %v74_v24 = vpop.permute.xlu0 %73  ;;  %v139_v28 = vpop.permute.xlu2 %138 }
  0x7d   :  { %v89_v26 = vpop.permute.xlu1 %88 }
  0x7e   :  { %v91_v46 = vmul.f32 %v89_v26, %v306_v5  ;;  %v92_v49 = vmul.f32 %v89_v26, %v319_v12 }
  0x82   :  { %v76_v27 = vpop.permute.xlu0 %75  ;;  %v158_v32 = vpop.permute.xlu2 %157 }
  0x83   :  { %v79_v41 = vsel %vm77_vm4, %v76_v27, %v74_v24  ;;  %v78_v43 = vsel %vm77_vm4, %v74_v24, %v76_v27 }
  0x84   :  { %v85_v44 = vmul.f32 %v83_v23, %v79_v41  ;;  %v86_v50 = vmul.f32 %v83_v23, %v78_v43 }
  0x85   :  { %v124_v29 = vpop.permute.xlu1 %123 }
  0x86   :  { %v129_v51 = vsel %vm127_vm6, %v126_v25, %v124_v29  ;;  %v93_v52 = vadd.f32 %v91_v46, %v85_v44  ;;  %v128_v56 = vsel %vm127_vm6, %v124_v29, %v126_v25  ;;  %v94_v10 = vadd.f32 %v92_v49, %v86_v50 }
  0x8a   :  { %v113_v30 = vpop.permute.xlu0 %112  ;;  %v173_v35 = vpop.permute.xlu2 %172 }
  0x8b   :  { %v116_v45 = vsel %vm114_vm5, %v113_v30, %v111_v22  ;;  %v115_v53 = vsel %vm114_vm5, %v111_v22, %v113_v30 }
  0x8d   :  { %v132_v31 = vpop.permute.xlu1 %131 }
  0x8e   :  { %v134_v54 = vmul.f32 %v132_v31, %v129_v51  ;;  %v135_v11 = vmul.f32 %v132_v31, %v128_v56 }
  0x92   :  { %v119_v33 = vpop.permute.xlu0 %118  ;;  %v166_v38 = vpop.permute.xlu2 %165 }
  0x93   :  { %v121_v47 = vmul.f32 %v119_v33, %v116_v45  ;;  %v122_v57 = vmul.f32 %v119_v33, %v115_v53 }
  0x95   :  { %v141_v34 = vpop.permute.xlu1 %140  ;;  %v136_v61 = vadd.f32 %v134_v54, %v121_v47  ;;  %v137_v19 = vadd.f32 %v135_v11, %v122_v57 }
  0x96   :  { %v144_v55 = vsel %vm142_vm7, %v141_v34, %v139_v28  ;;  %v143_v6 = vsel %vm142_vm7, %v139_v28, %v141_v34 }
  0x9a   :  { %v160_v36 = vpop.permute.xlu0 %159  ;;  %v186_v42 = vpop.permute.xlu2 %185 }
  0x9b   :  { %v162_v62 = vsel %vm161_vm8, %v158_v32, %v160_v36  ;;  %v163_v1 = vsel %vm161_vm8, %v160_v36, %v158_v32 }
  0x9c   :  { %v168_v15 = vmul.f32 %v166_v38, %v162_v62  ;;  %v169_v16 = vmul.f32 %v166_v38, %v163_v1 }
  0x9d   :  { %v171_v37 = vpop.permute.xlu1 %170 }
  0x9e   :  { %v175_v2 = vsel %vm174_vm10, %v171_v37, %v173_v35  ;;  %v176_v4 = vsel %vm174_vm10, %v173_v35, %v171_v37 }
  0xa2   :  { %v98_v40 = vpop.permute.xlu0 %97  ;;  %v194_v14 = vpop.permute.xlu2 %193 }
  0xa3   :  { %v100_v58 = vsel %vm99_vm9, %v96_v21, %v98_v40  ;;  %v101_v63 = vsel %vm99_vm9, %v98_v40, %v96_v21 }
  0xa5   :  { %v147_v39 = vpop.permute.xlu1 %146 }
  0xa6   :  { %v149_v59 = vmul.f32 %v147_v39, %v144_v55  ;;  %v150_v12 = vmul.f32 %v147_v39, %v143_v6  ;;  %v279_v39 = vmov 0.0  }
  0xa7   :  { %219 = vst.msk [vmem:[%s383_s2] sm:$0xff] %vm218_vm14, %v279_v39 }
  0xa8   :  { %v151_v13 = vadd.f32 %v149_v59, %v136_v61  ;;  %v152_v27 = vadd.f32 %v150_v12, %v137_v19 }
  0xaa   :  { %v179_v60 = vpop.permute.xlu0 %178  ;;  %v153_v28 = vsel %vm69_vm12, %v151_v13, 0.0 }
  0xab   :  { %v181_v8 = vmul.f32 %v179_v60, %v175_v2  ;;  %v182_v9 = vmul.f32 %v179_v60, %v176_v4 }
  0xad   :  { %v183_v23 = vadd.f32 %v181_v8, %v168_v15  ;;  %v184_v24 = vadd.f32 %v182_v9, %v169_v16 }
  0xae   :  { %v104_v48 = vpop.permute.xlu1 %103  ;;  %v220_v7 = vld [vmem:[%s383_s2] sm:$0xff] }
  0xaf   :  { %v106_v0 = vmul.f32 %v104_v48, %v100_v58  ;;  %v107_v5 = vmul.f32 %v104_v48, %v101_v63 }
  0xb1   :  { %v108_v17 = vadd.f32 %v106_v0, %v93_v52  ;;  %v109_v20 = vadd.f32 %v107_v5, %v94_v10 }
  0xb3   :  { %v155_v31 = vadd.f32 %v153_v28, %v108_v17  ;;  %v156_v32 = vadd.f32 %v152_v27, %v109_v20 }
  0xb6   :  { %v188_v18 = vpop.permute.xlu1 %187 }
  0xb7   :  { %v190_v21 = vsel %vm189_vm11, %v186_v42, %v188_v18  ;;  %v191_v22 = vsel %vm189_vm11, %v188_v18, %v186_v42 }
  0xb8   :  { %v196_v25 = vmul.f32 %v194_v14, %v190_v21  ;;  %v197_v26 = vmul.f32 %v194_v14, %v191_v22 }
  0xba   :  { %v198_v29 = vadd.f32 %v196_v25, %v183_v23  ;;  %v199_v30 = vadd.f32 %v197_v26, %v184_v24 }
  0xbc   :  { %v201_v33 = vsel %vm72_vm13, %v199_v30, 0.0  ;;  %v202_v3 = vadd.f32 %v198_v29, %v155_v31 }
  0xbd   :  { %v203_v34 = vadd.f32 %v201_v33, %v156_v32 }
  0xbe   :  { %v207_v35 = vmul.f32 %v202_v3, %v202_v3 }
  0xbf   :  { %v204_v36 = vadd.f32 %v203_v34, %v202_v3  ;;  %v208_v37 = vmul.f32 %v203_v34, %v203_v34 }
  0xc1   :  { %205 = vadd.xlane.f32.xlu0 %v204_v36  ;;  %v209_v38 = vadd.f32 %v208_v37, %v207_v35 }
  0xc3   :  { %210 = vadd.xlane.f32.xlu1 %v209_v38 }
 0x134   :  { %v206_v40 = vpop.xlane.xlu0 %205 }
 0x136   :  { %v211_v41 = vpop.xlane.xlu1 %210 }
 0x137   :  { %v213_v42 = vsel %vm212_vm15, %v206_v40, %v211_v41 }
 0x138   :  { %v221_v43 = vadd.f32 %v220_v7, %v213_v42 }
 0x13a   :  { %223 = vst.msk [vmem:[%s383_s2] sm:$0xff] %vm218_vm14, %v221_v43 }

// kernel: block_forward.4
= control target key start
LH: loop header
LB: loop body
LE: loop exit
PB: predicated region body
PF: predicated region fallthrough
CT: control target
= control target key end

     0   :  { %v58_v0 = vlaneseq  ;;  %v467_v2 = vmov 1   ;;  %v468_v3 = vmov 0   ;;  %s469_s20 = smov 16   ;;  %v470_v5 = vmov 3   ;;  %s471_s23 = smov 17   ;;  %s598_s0 = inlined_call_operand.vmem [shape: f32[8,256], index: 0, kind: input, shape index: {}]   ;;  %s599_s1 = inlined_call_operand.vmem [shape: f32[8,9], index: 1, kind: input, shape index: {}]   ;;  %s600_s2 = inlined_call_operand.vmem [shape: f32[8,2], index: 2, kind: input, shape index: {}]   ;;  %s601_s3 = inlined_call_operand.vmem [shape: f32[8,4], index: 3, kind: input, shape index: {}]   ;;  %s602_s4 = inlined_call_operand.vmem [shape: f32[16,256], index: 4, kind: output, shape index: {0}]   ;;  %s603_s5 = inlined_call_operand.vmem [shape: f32[1,8,2], index: 5, kind: output, shape index: {1}]  }
   0x1   :  { %v518_v1 = vld [vmem:[%s598_s0] sm:$0xff]  ;;  %456 = vset.pattern.permute.xlu1 %v467_v2  ;;  %455 = vset.pattern.permute.xlu0 %v468_v3  ;;  %v533_v10 = vld [vmem:[%s598_s0 + $0x8] sm:$0xff]  ;;  %s472_s24 = smov 1   ;;  %v473_v13 = vmov 4   ;;  %s474_s0 = smov 15   ;;  %v475_v16 = vmov 7  }
   0x2   :  { %147 = vrot.lane.b32.xlu1 %v518_v1, %s469_s20  ;;  %v522_v4 = vand.u32 127, %v58_v0  ;;  %457 = vset.pattern.permute.xlu2 %v470_v5  ;;  %v57_v12 = vld [vmem:[%s599_s1] sm:$0xff]  ;;  %v476_v17 = vmov 6   ;;  %s477_s1 = smov 113   ;;  %v478_v18 = vmov 2   ;;  %s479_s27 = smov 112  }
   0x3   :  { %s480_s28 = smov 127   ;;  %v481_v19 = vmov 5   ;;  %v228_v20 = vld [vmem:[%s600_s2] sm:$0xff]  ;;  %s482_s6 = smov 111   ;;  %v483_v21 = vmov 8   ;;  %vm247_vm14 = vcmask 1043456  }
   0x4   :  { %v65_v6 = vand.u32 15, %v522_v4  ;;  %v526_v7 = vadd.s32 128, %v522_v4  ;;  %vm101_vm4 = vcmp.lt.s32.totalorder %v522_v4, 1  ;;  %vm138_vm5 = vcmp.lt.s32.totalorder %v522_v4, 17 }
   0x5   :  { %vm151_vm6 = vcmp.lt.s32.totalorder %v522_v4, 16  ;;  %vm166_vm7 = vcmp.lt.s32.totalorder %v522_v4, 15  ;;  %vm123_vm8 = vcmp.lt.s32.totalorder %v522_v4, 127  ;;  %vm185_vm9 = vcmp.lt.s32.totalorder %v522_v4, 113 }
   0x6   :  { %vm85_vm0 = vcmp.ne.s32.totalorder %v65_v6, 15  ;;  %v72_v8 = vand.u32 15, %v526_v7  ;;  %vm89_vm3 = vcmp.ne.s32.totalorder %v65_v6, 0  ;;  %vm198_vm10 = vcmp.lt.s32.totalorder %v522_v4, 112 }
   0x7   :  { %v87_v9 = vsel %vm85_vm0, %v518_v1, 0.0  ;;  %v91_v15 = vsel %vm89_vm3, %v518_v1, 0.0  ;;  %vm213_vm11 = vcmp.lt.s32.totalorder %v522_v4, 111  ;;  %vm93_vm12 = vcmp.ge.s32.totalorder %v522_v4, 16 }
   0x8   :  { %134 = vrot.lane.b32.xlu0 %v87_v9, %s471_s23  ;;  %97 = vrot.lane.b32.xlu2 %v87_v9, %s472_s24  ;;  %vm86_vm1 = vcmp.ne.s32.totalorder %v72_v8, 15  ;;  %vm90_vm2 = vcmp.ne.s32.totalorder %v72_v8, 0  ;;  %vm96_vm13 = vcmp.lt.s32.totalorder %v526_v7, 240  ;;  %vm269_vm15 = vcmask 31744  }
   0x9   :  { %v88_v11 = vsel %vm86_vm1, %v533_v10, 0.0  ;;  %v92_v14 = vsel %vm90_vm2, %v533_v10, 0.0  ;;  %vm385_vm0 = vcmask 15360   ;;  %vm379_vm1 = vcmask 7168  }
   0xa   :  { %149 = vrot.lane.b32.xlu1 %v533_v10, %s469_s20 }
  0x10   :  { %136 = vrot.lane.b32.xlu0 %v88_v11, %s471_s23  ;;  %99 = vrot.lane.b32.xlu2 %v88_v11, %s472_s24 }
  0x12   :  { %155 = vperm.xlu1 %456, %v57_v12  }
  0x18   :  { %142 = vperm.xlu0 %455, %v57_v12   ;;  %106 = vperm.xlu2 %457, %v57_v12  }
  0x1a   :  { %458 = vset.pattern.permute.xlu1 %v473_v13 }
  0x1b   :  { %112 = vperm.xlu1 %458, %v57_v12  }
  0x20   :  { %164 = vrot.lane.b32.xlu0 %v92_v14, %s474_s0  ;;  %162 = vrot.lane.b32.xlu2 %v91_v15, %s474_s0 }
  0x21   :  { %461 = vset.pattern.permute.xlu0 %v475_v16  ;;  %460 = vset.pattern.permute.xlu2 %v476_v17 }
  0x23   :  { %181 = vrot.lane.b32.xlu1 %v87_v9, %s477_s1 }
  0x24   :  { %459 = vset.pattern.permute.xlu1 %v478_v18 }
  0x28   :  { %194 = vrot.lane.b32.xlu0 %v518_v1, %s479_s27  ;;  %183 = vrot.lane.b32.xlu2 %v88_v11, %s477_s1 }
  0x2b   :  { %196 = vrot.lane.b32.xlu1 %v533_v10, %s479_s27 }
  0x30   :  { %121 = vrot.lane.b32.xlu0 %v92_v14, %s480_s28  ;;  %119 = vrot.lane.b32.xlu2 %v91_v15, %s480_s28 }
  0x33   :  { %170 = vperm.xlu1 %459, %v57_v12  }
  0x38   :  { %202 = vperm.xlu0 %461, %v57_v12   ;;  %189 = vperm.xlu2 %460, %v57_v12  }
  0x3b   :  { %462 = vset.pattern.permute.xlu1 %v481_v19 }
  0x3c   :  { %127 = vperm.xlu1 %462, %v57_v12  }
  0x40   :  { %464 = vset.pattern.permute.xlu0 %v468_v3  ;;  %209 = vrot.lane.b32.xlu2 %v91_v15, %s482_s6 }
  0x41   :  { %231 = vperm.xlu0 %464, %v228_v20   ;;  %463 = vset.pattern.permute.xlu2 %v483_v21 }
  0x44   :  { %211 = vrot.lane.b32.xlu1 %v92_v14, %s482_s6 }
  0x45   :  { %465 = vset.pattern.permute.xlu1 %v467_v2 }
  0x48   :  { %217 = vperm.xlu2 %463, %v57_v12  }
  0x49   :  { %466 = vset.pattern.permute.xlu0 %v467_v2 }
  0x4c   :  { %237 = vperm.xlu1 %465, %v228_v20  }
  0x62   :  { %v98_v22 = vpop.permute.xlu2 %97 }
  0x6a   :  { %v100_v23 = vpop.permute.xlu2 %99 }
  0x6b   :  { %v103_v42 = vsel %vm101_vm4, %v100_v23, %v98_v22  ;;  %v102_v44 = vsel %vm101_vm4, %v98_v22, %v100_v23 }
  0x72   :  { %v107_v26 = vpop.permute.xlu2 %106 }
  0x73   :  { %v109_v47 = vmul.f32 %v107_v26, %v103_v42  ;;  %v110_v51 = vmul.f32 %v107_v26, %v102_v44 }
  0x74   :  { %v148_v24 = vpop.permute.xlu1 %147 }
  0x7a   :  { %v135_v25 = vpop.permute.xlu0 %134  ;;  %v163_v30 = vpop.permute.xlu2 %162 }
  0x7c   :  { %v150_v27 = vpop.permute.xlu1 %149 }
  0x7d   :  { %v153_v48 = vsel %vm151_vm6, %v150_v27, %v148_v24  ;;  %v152_v54 = vsel %vm151_vm6, %v148_v24, %v150_v27 }
  0x82   :  { %v137_v28 = vpop.permute.xlu0 %136  ;;  %v184_v33 = vpop.permute.xlu2 %183 }
  0x83   :  { %v140_v45 = vsel %vm138_vm5, %v137_v28, %v135_v25  ;;  %v139_v52 = vsel %vm138_vm5, %v135_v25, %v137_v28 }
  0x84   :  { %v156_v29 = vpop.permute.xlu1 %155 }
  0x85   :  { %v158_v53 = vmul.f32 %v156_v29, %v153_v48  ;;  %v159_v11 = vmul.f32 %v156_v29, %v152_v54  ;;  %v257_v48 = vld [vmem:[%s601_s3] sm:$0xff] }
  0x8a   :  { %v143_v31 = vpop.permute.xlu0 %142  ;;  %v120_v36 = vpop.permute.xlu2 %119 }
  0x8b   :  { %v145_v46 = vmul.f32 %v143_v31, %v140_v45  ;;  %v146_v55 = vmul.f32 %v143_v31, %v139_v52 }
  0x8d   :  { %v113_v32 = vpop.permute.xlu1 %112  ;;  %v160_v57 = vadd.f32 %v158_v53, %v145_v46  ;;  %v161_v20 = vadd.f32 %v159_v11, %v146_v55 }
  0x8e   :  { %v115_v49 = vmul.f32 %v113_v32, %v518_v1  ;;  %v116_v58 = vmul.f32 %v113_v32, %v533_v10 }
  0x90   :  { %v117_v62 = vadd.f32 %v115_v49, %v109_v47  ;;  %v118_v12 = vadd.f32 %v116_v58, %v110_v51 }
  0x92   :  { %v165_v34 = vpop.permute.xlu0 %164  ;;  %v190_v39 = vpop.permute.xlu2 %189 }
  0x93   :  { %v168_v56 = vsel %vm166_vm7, %v165_v34, %v163_v30  ;;  %v167_v8 = vsel %vm166_vm7, %v163_v30, %v165_v34 }
  0x95   :  { %v182_v35 = vpop.permute.xlu1 %181 }
  0x96   :  { %v186_v63 = vsel %vm185_vm9, %v182_v35, %v184_v33  ;;  %v187_v2 = vsel %vm185_vm9, %v184_v33, %v182_v35 }
  0x97   :  { %v192_v16 = vmul.f32 %v190_v39, %v186_v63  ;;  %v193_v17 = vmul.f32 %v190_v39, %v187_v2 }
  0x9a   :  { %v195_v37 = vpop.permute.xlu0 %194  ;;  %v210_v43 = vpop.permute.xlu2 %209 }
  0x9d   :  { %v197_v38 = vpop.permute.xlu1 %196 }
  0x9e   :  { %v199_v3 = vsel %vm198_vm10, %v195_v37, %v197_v38  ;;  %v200_v5 = vsel %vm198_vm10, %v197_v38, %v195_v37 }
  0xa2   :  { %v122_v41 = vpop.permute.xlu0 %121  ;;  %v218_v15 = vpop.permute.xlu2 %217 }
  0xa3   :  { %v124_v59 = vsel %vm123_vm8, %v120_v36, %v122_v41  ;;  %v125_v0 = vsel %vm123_vm8, %v122_v41, %v120_v36 }
  0xa5   :  { %v171_v40 = vpop.permute.xlu1 %170 }
  0xa6   :  { %v173_v60 = vmul.f32 %v171_v40, %v168_v56  ;;  %v174_v13 = vmul.f32 %v171_v40, %v167_v8 }
  0xa8   :  { %v175_v14 = vadd.f32 %v173_v60, %v160_v57  ;;  %v176_v28 = vadd.f32 %v174_v13, %v161_v20 }
  0xaa   :  { %v203_v61 = vpop.permute.xlu0 %202  ;;  %v177_v29 = vsel %vm93_vm12, %v175_v14, 0.0 }
  0xab   :  { %v205_v9 = vmul.f32 %v203_v61, %v199_v3  ;;  %v206_v10 = vmul.f32 %v203_v61, %v200_v5 }
  0xad   :  { %v207_v24 = vadd.f32 %v205_v9, %v192_v16  ;;  %v208_v25 = vadd.f32 %v206_v10, %v193_v17 }
  0xae   :  { %v128_v50 = vpop.permute.xlu1 %127 }
  0xaf   :  { %v130_v1 = vmul.f32 %v128_v50, %v124_v59  ;;  %v131_v6 = vmul.f32 %v128_v50, %v125_v0 }
  0xb1   :  { %v132_v18 = vadd.f32 %v130_v1, %v117_v62  ;;  %v133_v21 = vadd.f32 %v131_v6, %v118_v12  ;;  %v484_v1 = vmov 0.0  }
  0xb2   :  { %386 = vst.msk [vmem:[%s603_s5] sm:$0xff] %vm385_vm0, %v484_v1 }
  0xb3   :  { %v179_v32 = vadd.f32 %v177_v29, %v132_v18  ;;  %v180_v33 = vadd.f32 %v176_v28, %v133_v21  ;;  %v232_v34 = vpop.permute.xlu0 %231 }
  0xb6   :  { %v212_v19 = vpop.permute.xlu1 %211 }
  0xb7   :  { %v214_v22 = vsel %vm213_vm11, %v210_v43, %v212_v19  ;;  %v215_v23 = vsel %vm213_vm11, %v212_v19, %v210_v43 }
  0xb8   :  { %v220_v26 = vmul.f32 %v218_v15, %v214_v22  ;;  %v221_v27 = vmul.f32 %v218_v15, %v215_v23 }
  0xb9   :  { %v387_v2 = vld [vmem:[%s603_s5] sm:$0xff] }
  0xba   :  { %v222_v30 = vadd.f32 %v220_v26, %v207_v24  ;;  %v223_v31 = vadd.f32 %v221_v27, %v208_v25 }
  0xbc   :  { %v225_v35 = vsel %vm96_vm13, %v223_v31, 0.0  ;;  %v226_v36 = vadd.f32 %v222_v30, %v179_v32 }
  0xbd   :  { %v227_v4 = vadd.f32 %v225_v35, %v180_v33 }
  0xbe   :  { %v234_v37 = vmul.f32 %v232_v34, %v226_v36  ;;  %v238_v38 = vpop.permute.xlu1 %237 }
  0xbf   :  { %v235_v39 = vmul.f32 %v232_v34, %v227_v4 }
  0xc0   :  { %v240_v40 = vadd.f32 %v238_v38, %v234_v37 }
  0xc1   :  { %v241_v41 = vadd.f32 %v238_v38, %v235_v39 }
  0xc2   :  { %v242_v42 = vmax.f32 %v240_v40, 0.0 }
  0xc3   :  { %v243_v43 = vmax.f32 %v241_v41, 0.0 }
  0xc4   :  { %251 = vst.sshfl [vmem:[#allocation1] sm:$0xff pattern:$0x75316420] %v242_v42 }
  0xc5   :  { %v246_v44 = vrot.slane %v243_v43, 4  ;;  %252 = vst.sshfl [vmem:[#allocation1 + $0x8] sm:$0xff pattern:$0x75316420] %v243_v43 }
  0xc7   :  { %v248_v7 = vsel %vm247_vm14, %v242_v42, %v246_v44 }
  0xc8   :  { %262 = vst [vmem:[#allocation1] ss:$2 sm:$0xff] %v248_v7 }
  0xcc   :  { %v254_v45 = vld [vmem:[#allocation1 + $0x1] ss:$2 sm:$0xff] }
  0xcd   :  { %264 = vst [vmem:[#allocation1 + $0x10] ss:$2 sm:$0xff] %v254_v45 }
  0xcf   :  { %v265_v46 = vld.sshfl [vmem:[#allocation1] sm:$0xff pattern:$0x75316420]  ;;  %v266_v47 = vld.sshfl [vmem:[#allocation1 + $0x8] sm:$0xff pattern:$0x75316420] }
  0xd0   :  { %429 = vmatpush.msk.msra.mxu0 %vm247_vm14, %v265_v46  ;;  %431 = vmatpush.msk.msra.mxu1 %vm247_vm14, %v266_v47 }
  0xd1   :  { %430 = vmatmul.msk.f32.vlgmr.msra.gmra.mxu0 %vm269_vm15, %v257_v48  ;;  %432 = vmatmul.msk.f32.vlgmr.msra.gmra.mxu1 %vm269_vm15, %v257_v48 }
  0xd4   :  { %v267_v49 = vld.sshfl [vmem:[#allocation1 + $0x10] sm:$0xff pattern:$0x75316420]  ;;  %v268_v50 = vld.sshfl [vmem:[#allocation1 + $0x18] sm:$0xff pattern:$0x75316420] }
  0xd5   :  { %433 = vmatpush.msk.msra.mxu2 %vm247_vm14, %v267_v49  ;;  %435 = vmatpush.msk.msra.mxu3 %vm247_vm14, %v268_v50 }
  0xd6   :  { %434 = vmatmul.msk.f32.vlgmr.msra.gmra.mxu2 %vm269_vm15, %v257_v48  ;;  %436 = vmatmul.msk.f32.vlgmr.msra.gmra.mxu3 %vm269_vm15, %v257_v48 }
 0x14e   :  { %v298_v51 = vpop.f32.mrf.mxu0  ;;  %v318_v52 = vpop.f32.mrf.mxu1 }
 0x14f   :  { %361 = vst [vmem:[%s602_s4] sm:$0xff] %v298_v51  ;;  %v370_v53 = vmul.f32 %v298_v51, %v298_v51  ;;  %v371_v54 = vmul.f32 %v318_v52, %v318_v52  ;;  %v365_v55 = vadd.f32 %v318_v52, %v298_v51 }
 0x150   :  { %362 = vst [vmem:[%s602_s4 + $0x8] sm:$0xff] %v318_v52 }
 0x151   :  { %v374_v56 = vadd.f32 %v371_v54, %v370_v53 }
 0x159   :  { %v338_v57 = vpop.f32.mrf.mxu2  ;;  %v358_v58 = vpop.f32.mrf.mxu3 }
 0x15a   :  { %363 = vst [vmem:[%s602_s4 + $0x10] sm:$0xff] %v338_v57  ;;  %v366_v59 = vadd.f32 %v365_v55, %v338_v57  ;;  %v372_v60 = vmul.f32 %v338_v57, %v338_v57  ;;  %v373_v61 = vmul.f32 %v358_v58, %v358_v58 }
 0x15b   :  { %364 = vst [vmem:[%s602_s4 + $0x18] sm:$0xff] %v358_v58 }
 0x15c   :  { %v367_v62 = vadd.f32 %v366_v59, %v358_v58  ;;  %v375_v63 = vadd.f32 %v374_v56, %v372_v60 }
 0x15e   :  { %368 = vadd.xlane.f32.xlu2 %v367_v62  ;;  %v376_v0 = vadd.f32 %v375_v63, %v373_v61 }
 0x160   :  { %377 = vadd.xlane.f32.xlu1 %v376_v0 }
 0x1d1   :  { %v369_v3 = vpop.xlane.xlu2 %368 }
 0x1d3   :  { %v378_v5 = vpop.xlane.xlu1 %377 }
 0x1d4   :  { %v380_v6 = vsel %vm379_vm1, %v369_v3, %v378_v5 }
 0x1d5   :  { %v388_v8 = vadd.f32 %v387_v2, %v380_v6 }
 0x1d7   :  { %390 = vst.msk [vmem:[%s603_s5] sm:$0xff] %vm385_vm0, %v388_v8 }

</bundles_post_ra>
